<compile_context>
chip_gen: v6e
topology: v6e:2x2x1
jax: 0.10.0
libtpu: 0.0.40
codegen_flags: <defaults>
</compile_context>

<pallas_src>
import functools

import jax
import jax.numpy as jnp
from jax.experimental import pallas as pl
from jax.experimental.pallas import tpu as pltpu


# ---------------------------------------------------------------------------
# Pairwise (MXU) kernel: out[i, j] = cos(a[i], b[j]) / temp
# ---------------------------------------------------------------------------
def _pairwise_cos_kernel(a_ref, b_ref, o_ref, *, inv_temp, eps2):
    a = a_ref[...].astype(jnp.float32)          # (tm, H)
    b = b_ref[...].astype(jnp.float32)          # (tn, H)
    # Per-norm eps clamp (matches torch: x / max(||x||, eps)).  rsqrt hits the
    # EUP; a single multiply replaces sqrt + divide.
    an = a * jax.lax.rsqrt(jnp.maximum(jnp.sum(a * a, axis=-1, keepdims=True), eps2))
    bn = b * jax.lax.rsqrt(jnp.maximum(jnp.sum(b * b, axis=-1, keepdims=True), eps2))
    # MXU matmul with f32 accumulation; HIGHEST keeps f32 operand precision.
    cos = jax.lax.dot_general(
        an, bn, (((1,), (1,)), ((), ())),
        preferred_element_type=jnp.float32,
        precision=jax.lax.Precision.HIGHEST,
    )
    o_ref[...] = (cos * inv_temp).astype(o_ref.dtype)


def _pairwise_similarity(a, b, temp, eps, out_dtype):
    """a: (M, H), b: (N, H)  ->  (M, N) cosine similarity / temp."""
    M, H = a.shape
    N, _ = b.shape
    # 256-wide tiles (MXU-native on v6e/v7x, multiple of 128 for v5e); drop to
    # 128 for very large H to keep the double-buffered working set in VMEM.
    tile = 256 if H <= 4096 else 128
    tm = M if M <= tile else tile
    tn = N if N <= tile else tile
    grid = (pl.cdiv(M, tm), pl.cdiv(N, tn))

    kernel = functools.partial(
        _pairwise_cos_kernel, inv_temp=float(1.0 / temp), eps2=float(eps) ** 2
    )
    return pl.pallas_call(
        kernel,
        out_shape=jax.ShapeDtypeStruct((M, N), out_dtype),
        grid_spec=pltpu.PrefetchScalarGridSpec(
            num_scalar_prefetch=0,
            grid=grid,
            in_specs=[
                pl.BlockSpec((tm, H), lambda i, j: (i, 0)),
                pl.BlockSpec((tn, H), lambda i, j: (j, 0)),
            ],
            out_specs=pl.BlockSpec((tm, tn), lambda i, j: (i, j)),
        ),
        compiler_params=pltpu.CompilerParams(
            dimension_semantics=("parallel", "parallel"),
            vmem_limit_bytes=48 * 1024 * 1024,
        ),
    )(a, b)


# ---------------------------------------------------------------------------
# General row-wise kernel (fallback): lane-dense (G, 128) output per step
# ---------------------------------------------------------------------------
def _rowwise_cos_kernel(x_ref, y_ref, o_ref, *, inv_temp, eps2):
    x = x_ref[...].astype(jnp.float32)          # (G, 128, H)
    y = y_ref[...].astype(jnp.float32)
    dot = jnp.sum(x * y, axis=-1)               # (G, 128)
    ssx = jnp.sum(x * x, axis=-1)
    ssy = jnp.sum(y * y, axis=-1)
    denom_sq = jnp.maximum(ssx, eps2) * jnp.maximum(ssy, eps2)
    o_ref[...] = (dot * jax.lax.rsqrt(denom_sq) * inv_temp).astype(o_ref.dtype)


def _rowwise_similarity(xb, yb, temp, eps, out_dtype):
    """xb, yb: (N, H) already broadcast to a common shape -> (N,)."""
    n_rows, H = xb.shape
    LANES = 128
    pad = (-n_rows) % LANES
    if pad:  # pad only when needed; padded rows are masked off in the slice below
        xb = jnp.pad(xb, ((0, pad), (0, 0)))
        yb = jnp.pad(yb, ((0, pad), (0, 0)))
    n_tot = n_rows + pad
    ng = n_tot // LANES
    x3 = xb.reshape(ng, LANES, H)
    y3 = yb.reshape(ng, LANES, H)

    # Pick the group-tile G (each group = 128 rows).  The output block's
    # second-to-last dim must be a multiple of 8 or the full dim, so when
    # tiling we use a multiple of 8 groups (>= 1024 rows / step).
    per_group = 6 * LANES * H * 4          # 2 inputs x 2 buffers + f32 temps
    budget = 24 << 20
    G = ng
    if ng * per_group > budget:
        G = max(8, min(64, (budget // max(per_group, 1)) // 8 * 8))
        if G >= ng:
            G = ng
    grid = (pl.cdiv(ng, G),)

    kernel = functools.partial(
        _rowwise_cos_kernel, inv_temp=float(1.0 / temp), eps2=float(eps) ** 2
    )
    out = pl.pallas_call(
        kernel,
        out_shape=jax.ShapeDtypeStruct((ng, LANES), out_dtype),
        grid_spec=pltpu.PrefetchScalarGridSpec(
            num_scalar_prefetch=0,
            grid=grid,
            in_specs=[
                pl.BlockSpec((G, LANES, H), lambda i: (i, 0, 0)),
                pl.BlockSpec((G, LANES, H), lambda i: (i, 0, 0)),
            ],
            out_specs=pl.BlockSpec((G, LANES), lambda i: (i, 0)),
        ),
        compiler_params=pltpu.CompilerParams(
            dimension_semantics=("parallel",),
            vmem_limit_bytes=48 * 1024 * 1024,
        ),
    )(x3, y3)
    return out.reshape(-1)[:n_rows]


# ---------------------------------------------------------------------------
# Dispatcher
# ---------------------------------------------------------------------------
def _match_pairwise(x_shape, y_shape, H):
    """Detect x:(M,1,H) vs y:(1,N,H) (or the mirror) without materializing it."""
    if max(len(x_shape), len(y_shape)) != 3:
        return None
    xs = (1,) * (3 - len(x_shape)) + tuple(x_shape)
    ys = (1,) * (3 - len(y_shape)) + tuple(y_shape)
    if xs[2] != H or ys[2] != H:
        return None
    if xs[1] == 1 and ys[0] == 1:          # out[i,j] = cos(x[i], y[j])
        return ("xy", xs[0], ys[1])
    if xs[0] == 1 and ys[1] == 1:          # out[i,j] = cos(y[i], x[j])
        return ("yx", ys[0], xs[1])
    return None


def similarity(x, y, temp, *, eps=1e-8):
    """Cosine similarity along the last axis divided by temp (Pallas TPU)."""
    out_shape_full = jnp.broadcast_shapes(x.shape, y.shape)
    H = out_shape_full[-1]
    out_dtype = jnp.result_type(x.dtype, y.dtype)

    match = _match_pairwise(x.shape, y.shape, H)
    if match is not None:
        mode, M, N = match
        if mode == "xy":
            a, b = x.reshape(M, H), y.reshape(N, H)   # free reshapes, no broadcast
        else:
            a, b = y.reshape(M, H), x.reshape(N, H)
        out = _pairwise_similarity(a, b, temp, eps, out_dtype)
        return out.reshape(out_shape_full[:-1])

    # General broadcasting fallback (typical use: same-shape x and y, where
    # broadcast_to is a no-op and nothing extra is materialized).
    xb = jnp.broadcast_to(x, out_shape_full).reshape(-1, H)
    yb = jnp.broadcast_to(y, out_shape_full).reshape(-1, H)
    out = _rowwise_similarity(xb, yb, temp, eps, out_dtype)
    return out.reshape(out_shape_full[:-1])


# ---------------------------------------------------------------------------
if __name__ == "__main__":
    temp = 0.05  # SimCSE-style temperature
    key = jax.random.PRNGKey(0)
    kx, ky = jax.random.split(key)

    def ref_sim(a, b, t, eps=1e-8):
        a = a.astype(jnp.float32)
        b = b.astype(jnp.float32)
        dot = jnp.sum(a * b, axis=-1)
        na = jnp.maximum(jnp.linalg.norm(a, axis=-1), eps)
        nb = jnp.maximum(jnp.linalg.norm(b, axis=-1), eps)
        return dot / (na * nb) / t

    # Canonical uctopic usage: x=(batch,1,hidden), y=(1,batch,hidden) -> (batch,batch)
    batch, hidden = 4, 32
    x = jax.random.normal(kx, (batch, 1, hidden), dtype=jnp.float32)
    y = jax.random.normal(ky, (1, batch, hidden), dtype=jnp.float32)

    out = jax.block_until_ready(similarity(x, y, temp))
    ref = ref_sim(x, y, temp)
    assert out.shape == (batch, batch), out.shape
    # Tolerance covers rsqrt / normalize-then-matmul reassociation (f32 path).
    assert jnp.allclose(out, ref, atol=1e-4, rtol=1e-4), (out, ref)

    # Also exercise the general (same-shape) fallback path.
    xs = jax.random.normal(kx, (6, hidden), dtype=jnp.float32)
    ys = jax.random.normal(ky, (6, hidden), dtype=jnp.float32)
    out2 = jax.block_until_ready(similarity(xs, ys, temp))
    ref2 = ref_sim(xs, ys, temp)
    assert out2.shape == (6,), out2.shape
    assert jnp.allclose(out2, ref2, atol=1e-4, rtol=1e-4), (out2, ref2)

    print("KERNEL_OK")
</pallas_src>

<mosaic_0001>
module attributes {stable_mosaic.version = 11 : i64} {
  func.func @_pairwise_cos_kernel(%arg0: i32, %arg1: i32, %arg2: memref<4x32xf32, #tpu.memory_space<vmem>>, %arg3: memref<4x32xf32, #tpu.memory_space<vmem>>, %arg4: memref<4x4xf32, #tpu.memory_space<vmem>>) attributes {dimension_semantics = [#tpu.dimension_semantics<parallel>, #tpu.dimension_semantics<parallel>], iteration_bounds = array<i64: 1, 1>, scalar_prefetch = 0 : i64, scratch_operands = 0 : i64, tpu.core_type = #tpu.core_type<tc>, window_params = [{transform_indices = @transform_0, window_bounds = array<i64: 4, 32>}, {transform_indices = @transform_1, window_bounds = array<i64: 4, 32>}, {transform_indices = @transform_2, window_bounds = array<i64: 4, 4>}]} {
    %c0 = arith.constant 0 : index
    %c0_0 = arith.constant 0 : index
    %0 = vector.load %arg2[%c0, %c0_0] : memref<4x32xf32, #tpu.memory_space<vmem>>, vector<4x32xf32>
    %c0_1 = arith.constant 0 : index
    %c0_2 = arith.constant 0 : index
    %1 = vector.load %arg3[%c0_1, %c0_2] : memref<4x32xf32, #tpu.memory_space<vmem>>, vector<4x32xf32>
    %2 = arith.mulf %0, %0 : vector<4x32xf32>
    %cst = arith.constant dense<0.000000e+00> : vector<4xf32>
    %3 = vector.multi_reduction <add>, %2, %cst [1] : vector<4x32xf32> to vector<4xf32>
    %4 = vector.shape_cast %3 : vector<4xf32> to vector<4x1xf32>
    %cst_3 = arith.constant 1.000000e-16 : f32
    %5 = vector.broadcast %cst_3 : f32 to vector<4x1xf32>
    %6 = arith.maximumf %4, %5 : vector<4x1xf32>
    %7 = math.rsqrt %6 : vector<4x1xf32>
    %8 = vector.broadcast %7 : vector<4x1xf32> to vector<4x32xf32>
    %9 = arith.mulf %0, %8 : vector<4x32xf32>
    %10 = arith.mulf %1, %1 : vector<4x32xf32>
    %cst_4 = arith.constant dense<0.000000e+00> : vector<4xf32>
    %11 = vector.multi_reduction <add>, %10, %cst_4 [1] : vector<4x32xf32> to vector<4xf32>
    %12 = vector.shape_cast %11 : vector<4xf32> to vector<4x1xf32>
    %cst_5 = arith.constant 1.000000e-16 : f32
    %13 = vector.broadcast %cst_5 : f32 to vector<4x1xf32>
    %14 = arith.maximumf %12, %13 : vector<4x1xf32>
    %15 = math.rsqrt %14 : vector<4x1xf32>
    %16 = vector.broadcast %15 : vector<4x1xf32> to vector<4x32xf32>
    %17 = arith.mulf %1, %16 : vector<4x32xf32>
    %cst_6 = arith.constant dense<0.000000e+00> : vector<4x4xf32>
    %18 = tpu.matmul %9, %17, %cst_6 {dimension_numbers = #tpu.dot_dimension_numbers<[1], [1], [0], [0], [0, 0, 1, 0], [], []>, precision = #tpu.contract_precision<fp32>} : vector<4x32xf32>, vector<4x32xf32>, vector<4x4xf32> -> vector<4x4xf32>
    %cst_7 = arith.constant 2.000000e+01 : f32
    %19 = vector.broadcast %cst_7 : f32 to vector<4x4xf32>
    %20 = arith.mulf %18, %19 : vector<4x4xf32>
    %c0_8 = arith.constant 0 : index
    %c0_9 = arith.constant 0 : index
    %21 = vector.load %arg4[%c0_8, %c0_9] : memref<4x4xf32, #tpu.memory_space<vmem>>, vector<4x4xf32>
    tpu.vector_store %arg4[%c0_8, %c0_9], %20 {strides = array<i32>} : memref<4x4xf32, #tpu.memory_space<vmem>>, vector<4x4xf32>,
    return
  }
  func.func @transform_0(%arg0: i32, %arg1: i32) -> (i32, i32) {
    %c0_i32 = arith.constant 0 : i32
    %c0_i32_0 = arith.constant 0 : i32
    return %arg0, %c0_i32 : i32, i32
  }
  func.func @transform_1(%arg0: i32, %arg1: i32) -> (i32, i32) {
    %c0_i32 = arith.constant 0 : i32
    %c0_i32_0 = arith.constant 0 : i32
    return %arg1, %c0_i32 : i32, i32
  }
  func.func @transform_2(%arg0: i32, %arg1: i32) -> (i32, i32) {
    %c0_i32 = arith.constant 0 : i32
    return %arg0, %arg1 : i32, i32
  }
}

</mosaic_0001>

<bundles_post_ra>
// kernel: tpu_custom_call.1
= control target key start
LH: loop header
LB: loop body
LE: loop exit
PB: predicated region body
PF: predicated region fallthrough
CT: control target
= control target key end

     0   :  { %7 = vsyncpa [#allocation3], 0  ;;  %s677_s0 = inlined_call_operand.hbm [shape: f32[4,32], index: 0, kind: input, shape index: {}]   ;;  %s678_s1 = inlined_call_operand.hbm [shape: f32[4,32], index: 1, kind: input, shape index: {}]   ;;  %s679_s2 = inlined_call_operand.hbm [shape: f32[4,4], index: 2, kind: output, shape index: {}]  }
   0x1   :  { %8 = vsyncpa [#allocation6], 0 }
   0x2   :  { %9 = vsyncpa [#allocation4], 0  ;;  %s642_s9 = smov [#allocation2]   ;;  %s643_s11 = smov [#allocation5]  }
   0x3   :  { %s16_s10 = sshll.u32 %s642_s9, 4  ;;  %s26_s12 = sshll.u32 %s643_s11, 4  ;;  %s17_s10 = int_to_ptr.vmem [resolvable:$true] %s16_s10  ;;  %s27_s12 = int_to_ptr.vmem [resolvable:$true] %s26_s12 }
   0x4   :  { %s584_s13 = scalar_lea.vmem %s17_s10, 64  ;;  %p589_p1 = scmp.lt.s32.totalorder %s17_s10, %s17_s10 }
   0x5   :  { %p585_p0 = scmp.ne.s32.totalorder %s17_s10, %s584_s13  ;;  %p590_p2 = scmp.lt.s32.totalorder %s584_s13, %s584_s13 }
   0x7   :  { %p591_p3 = por %p590_p2, %p589_p1 }
   0x9   :  { %p592_p4 = pnand %p591_p3, %p585_p0 }
   0xb   :  { %595 = shalt.err (!%p592_p4)
}
   0xc   :  { %19 = dma.hbm_to_vmem [thread:$0]  %s677_s0, 64, %s17_s10, [#allocation3]  }
   0xd   :  { %s604_s16 = scalar_lea.vmem %s27_s12, 64  ;;  %p609_p6 = scmp.lt.s32.totalorder %s27_s12, %s27_s12 }
   0xe   :  { %p605_p5 = scmp.ne.s32.totalorder %s27_s12, %s604_s16  ;;  %p610_p7 = scmp.lt.s32.totalorder %s604_s16, %s604_s16 }
  0x10   :  { %p611_p8 = por %p610_p7, %p609_p6 }
  0x12   :  { %p612_p9 = pnand %p611_p8, %p605_p5 }
  0x14   :  { %615 = shalt.err (!%p612_p9)
}
  0x15   :  { %29 = dma.hbm_to_vmem [thread:$0]  %s678_s1, 64, %s27_s12, [#allocation6]  }
  0x16   :  { %636 = dma.done.wait [#allocation3], 64  }
  0x17   :  { %637 = vsyncadd [#allocation3], 4294967232 }
  0x18   :  { %638 = dma.done.wait [#allocation6], 64  }
  0x19   :  { %639 = vsyncadd [#allocation6], 4294967232  ;;  %v37_v0 = vld [vmem:[#allocation5] sm:$0xf]  ;;  %vm39_vm0 = vcmask 257024   ;;  %v644_v6 = vmov 0.0  }
  0x1a   :  { %v36_v1 = vld [vmem:[#allocation2] sm:$0xf]  ;;  %v46_v2 = vmul.f32 %v37_v0, %v37_v0  ;;  %537 = vmatprep.subr.mxu0 %v644_v6  ;;  %542 = vmatprep.subr.mxu1 %v644_v6  ;;  %vm645_vm1 = vmmov 0   ;;  %vm53_vm2 = vcmask 261120   ;;  %s646_s0 = smov [#allocation7]   ;;  %vm507_vm3 = vcmask 27648  }
  0x1b   :  { %v38_v3 = vmul.f32 %v36_v1, %v36_v1  ;;  %544 = vmatprep.mubr.msk.f32.mxu1 %vm645_vm1, %v644_v6  ;;  %539 = vmatprep.mubr.msk.f32.mxu0 %vm645_vm1, %v644_v6  ;;  %s515_s1 = sshll.u32 %s646_s0, 4  ;;  %s516_s1 = int_to_ptr.vmem [resolvable:$true] %s515_s1 }
  0x1c   :  { %v47_v4 = vsel %vm39_vm0, %v46_v2, 0.0  ;;  %s616_s19 = scalar_lea.vmem %s516_s1, 64  ;;  %p621_p11 = scmp.lt.s32.totalorder %s516_s1, %s516_s1 }
  0x1d   :  { %48 = vadd.xlane.f32.xlu0 %v47_v4  ;;  %v40_v5 = vsel %vm39_vm0, %v38_v3, 0.0  ;;  %p617_p10 = scmp.ne.s32.totalorder %s516_s1, %s616_s19  ;;  %p622_p12 = scmp.lt.s32.totalorder %s616_s19, %s616_s19 }
  0x1f   :  { %p623_p13 = por %p622_p12, %p621_p11 }
  0x21   :  { %41 = vadd.xlane.f32.xlu0 %v40_v5  ;;  %p624_p0 = pnand %p623_p13, %p617_p10 }
  0xa6   :  { %v49_v7 = vpop.xlane.xlu0 %48 }
  0xa7   :  { %v50_v8 = vmax.f32 %v49_v7, 1e-16 }
  0xa9   :  { %572 = vrsqrt.f32 %v50_v8 }
  0xaa   :  { %v42_v9 = vpop.xlane.xlu0 %41 }
  0xab   :  { %v43_v10 = vmax.f32 %v42_v9, 1e-16 }
  0xad   :  { %574 = vrsqrt.f32 %v43_v10 }
  0xb6   :  { %v573_v11 = vpop.eup %572 }
  0xb7   :  { %v52_v12 = vmul.f32 %v573_v11, %v37_v0 }
  0xb9   :  { %v58_v13 = vsel %vm53_vm2, %v52_v12, 0 }
  0xba   :  { %v575_v14 = vpop.eup %574  ;;  %v91_v15 = vand.u32 4294901760, %v58_v13 }
  0xbb   :  { %v45_v16 = vmul.f32 %v575_v14, %v36_v1 }
  0xbc   :  { %538 = vmatpush3.xpose.msra.mxu0 %v91_v15  ;;  %v168_v17 = vsub.f32 %v58_v13, %v91_v15 }
  0xbd   :  { %v55_v18 = vsel %vm53_vm2, %v45_v16, 0  ;;  %547 = vmatprep.subr.mxu0 %v644_v6 }
  0xbe   :  { %v169_v19 = vand.u32 4294901760, %v168_v17  ;;  %v126_v20 = vand.u32 4294901760, %v55_v18 }
  0xc0   :  { %v170_v21 = vsub.f32 %v168_v17, %v169_v19  ;;  %v127_v22 = vsub.f32 %v55_v18, %v126_v20 }
  0xc2   :  { %v171_v23 = vand.u32 4294901760, %v170_v21  ;;  %v128_v24 = vand.u32 4294901760, %v127_v22 }
  0xc4   :  { %543 = vmatpush3.xpose.msra.mxu1 %v171_v23  ;;  %v129_v25 = vsub.f32 %v127_v22, %v128_v24 }
  0xc5   :  { %552 = vmatprep.subr.mxu1 %v644_v6 }
  0xc6   :  { %v130_v26 = vand.u32 4294901760, %v129_v25 }
  0xc7   :  { %545 = vmatmul.mubr.f32.vlgmr.msra.gmra.mxu1 %v126_v20 }
  0xc8   :  { %540 = vmatmul.mubr.f32.vlgmr.msra.gmra.mxu0 %v130_v26  ;;  %553 = vmatpush3.xpose.msra.mxu1 %v91_v15 }
  0xc9   :  { %548 = vmatpush3.xpose.msra.mxu0 %v168_v17  ;;  %554 = vmatprep.mubr.msk.f32.mxu1 %vm645_vm1, %v644_v6 }
  0xca   :  { %549 = vmatprep.mubr.msk.f32.mxu0 %vm645_vm1, %v644_v6  ;;  %557 = vmatprep.subr.mxu0 %v644_v6 }
  0xcb   :  { %555 = vmatmul.mubr.f32.vlgmr.msra.gmra.mxu1 %v128_v24  ;;  %562 = vmatprep.subr.mxu1 %v644_v6 }
  0xcc   :  { %550 = vmatmul.mubr.f32.vlgmr.msra.gmra.mxu0 %v127_v22  ;;  %563 = vmatpush3.xpose.msra.mxu1 %v91_v15 }
  0xcd   :  { %558 = vmatpush3.xpose.msra.mxu0 %v169_v19  ;;  %564 = vmatprep.mubr.msk.f32.mxu1 %vm645_vm1, %v644_v6 }
  0xce   :  { %559 = vmatprep.mubr.msk.f32.mxu0 %vm645_vm1, %v644_v6 }
  0xcf   :  { %565 = vmatmul.mubr.f32.vlgmr.msra.gmra.mxu1 %v126_v20 }
  0xd0   :  { %560 = vmatmul.mubr.f32.vlgmr.msra.gmra.mxu0 %v126_v20 }
 0x187   :  { %v208_v27 = vpop.f32.mrf.mxu1 }
 0x188   :  { %v132_v28 = vpop.f32.mrf.mxu0 }
 0x189   :  { %v546_v29 = vpop.f32.mrf.mxu1  ;;  %v209_v31 = vadd.f32 %v208_v27, %v132_v28 }
 0x18a   :  { %v541_v30 = vpop.f32.mrf.mxu0 }
 0x18b   :  { %v356_v32 = vpop.f32.mrf.mxu1 }
 0x18c   :  { %v282_v33 = vpop.f32.mrf.mxu0 }
 0x18d   :  { %v283_v34 = vadd.f32 %v282_v33, %v209_v31  ;;  %v556_v35 = vpop.f32.mrf.mxu1 }
 0x18e   :  { %v551_v36 = vpop.f32.mrf.mxu0 }
 0x18f   :  { %v502_v37 = vpop.f32.mrf.mxu1  ;;  %v357_v38 = vadd.f32 %v356_v32, %v283_v34 }
 0x190   :  { %v430_v39 = vpop.f32.mrf.mxu0 }
 0x191   :  { %v431_v40 = vadd.f32 %v430_v39, %v357_v38  ;;  %v566_v41 = vpop.f32.mrf.mxu1 }
 0x192   :  { %v561_v42 = vpop.f32.mrf.mxu0 }
 0x193   :  { %v503_v43 = vadd.f32 %v502_v37, %v431_v40 }
 0x195   :  { %v506_v44 = vmul.f32 20.0, %v503_v43 }
 0x197   :  { %508 = vst.msk [vmem:[#allocation7] sm:$0xf] %vm507_vm3, %v506_v44 }
 0x198   :  { %627 = shalt.err (!%p624_p0)
}
 0x199   :  { %518 = dma.vmem_to_hbm [thread:$0]  %s516_s1, 64, %s679_s2, [#allocation4]  }
 0x19a   :  { %640 = dma.done.wait [#allocation4], 64  }
 0x19b   :  { %641 = vsyncadd [#allocation4], 4294967232 }
 0x19c   :  { %522 = vsyncpa [#allocation3], 1 }
 0x19d   :  { %523 = vsyncpa [#allocation6], 1 }
 0x19e   :  { %524 = vsyncpa [#allocation4], 1 }

</bundles_post_ra>
